<compile_context>
chip_gen: v7x
topology: tpu7x:2x2x1
jax: 0.10.0
libtpu: 0.0.40
codegen_flags: <defaults>
</compile_context>

<pallas_src>
import math

import jax
import jax.numpy as jnp
from jax.experimental import pallas as pl
from jax.experimental.pallas import tpu as pltpu

LN_EPS = 1e-5
ACT_DTYPE = jnp.bfloat16          # inter-kernel activation dtype


def _vmem_budget():
    """(vmem_limit_bytes, row_cap) per TPU generation."""
    try:
        cap = pltpu.get_tpu_info().vmem_capacity_bytes
    except Exception:             # robust to API / platform drift
        cap = None
    if cap is not None and cap >= 100 * 1024 * 1024:   # v5e / v6e: 128 MiB VMEM
        return 96 * 1024 * 1024, 1024
    if cap is not None:                                # v7x: 64 MiB per TensorCore
        return 32 * 1024 * 1024, 256
    return 32 * 1024 * 1024, 512                       # unknown: conservative


VMEM_LIMIT, ROW_CAP = _vmem_budget()


# ------------------------------ in-kernel helpers -----------------------------

def _layernorm(x, gamma, beta):
    mu = jnp.mean(x, axis=-1, keepdims=True)
    xc = x - mu
    var = jnp.mean(xc * xc, axis=-1, keepdims=True)
    return xc * jax.lax.rsqrt(var + LN_EPS) * gamma + beta


def _gelu_exact(x):
    # nn.GELU() default (erf form).  The tanh approximation would use the EUP slot
    # but changes numerics; kept exact to match the reference.
    return 0.5 * x * (1.0 + jax.lax.erf(x * 0.7071067811865476))


# ------------------------------ kernels ---------------------------------------

def _embed_kernel(x_ref, g0_ref, b0_ref, w_ref, b_ref, g1_ref, b1_ref,
                  pe_ref, o_ref):
    bt, n, din = x_ref.shape
    d = w_ref.shape[1]
    x = x_ref[...].astype(jnp.float32).reshape(bt * n, din)
    y = _layernorm(x, g0_ref[...], b0_ref[...])
    y = jnp.dot(y.astype(jnp.bfloat16), w_ref[...],
                preferred_element_type=jnp.float32) + b_ref[...]
    y = _layernorm(y, g1_ref[...], b1_ref[...])
    y = y.reshape(bt, n, d) + jnp.expand_dims(pe_ref[...], 0)   # + scaled PE
    o_ref[...] = y.astype(o_ref.dtype)


def _block_kernel(h_ref,
                  gpre_ref, bpre_ref, wq_ref, wk_ref, wv_ref, wout_ref,
                  gpost_ref, bpost_ref,
                  gf1_ref, bf1_ref, w1_ref, b1_ref, w2_ref, b2_ref,
                  gf2_ref, bf2_ref,
                  o_ref,
                  yln_scr, acc_scr):
    """One transformer block (attention branch + FF branch) fused.

    grid = (batch_tiles, heads); heads is a sequential reduction axis.
    """
    hd = pl.program_id(1)
    bt, n, d = h_ref.shape
    rows = bt * n
    dh = wq_ref.shape[2]

    @pl.when(hd == 0)
    def _():
        hin = h_ref[...].astype(jnp.float32).reshape(rows, d)
        yln_scr[...] = _layernorm(hin, gpre_ref[...], bpre_ref[...]
                                  ).astype(yln_scr.dtype)
        acc_scr[...] = jnp.zeros_like(acc_scr)

    y = yln_scr[...]                                    # (rows, d) bf16, resident
    # Per-head projections (scale already folded into wq at init, no biases).
    q = jnp.dot(y, wq_ref[hd], preferred_element_type=jnp.float32)
    k = jnp.dot(y, wk_ref[hd], preferred_element_type=jnp.float32)
    v = jnp.dot(y, wv_ref[hd], preferred_element_type=jnp.float32)

    qb = q.reshape(bt, n, dh).astype(jnp.bfloat16)
    kb = k.reshape(bt, n, dh).astype(jnp.bfloat16)
    vb = v.reshape(bt, n, dh).astype(jnp.bfloat16)
    s = jnp.einsum('bnd,bmd->bnm', qb, kb, preferred_element_type=jnp.float32)
    m = jnp.max(s, axis=-1, keepdims=True)
    p = jnp.exp(s - m)
    p = p * pl.reciprocal(jnp.sum(p, axis=-1, keepdims=True), approx=False)
    ob = jnp.einsum('bnm,bmd->bnd', p.astype(jnp.bfloat16), vb,
                    preferred_element_type=jnp.float32)
    # This head's slice of the (bias-free) output projection, accumulated.
    acc_scr[...] += jnp.dot(ob.reshape(rows, dh).astype(jnp.bfloat16),
                            wout_ref[hd], preferred_element_type=jnp.float32)

    @pl.when(hd == pl.num_programs(1) - 1)
    def _():
        hin = h_ref[...].astype(jnp.float32).reshape(rows, d)
        h_attn = _layernorm(acc_scr[...], gpost_ref[...], bpost_ref[...]) + hin
        yf = _layernorm(h_attn, gf1_ref[...], bf1_ref[...])
        yf = jnp.dot(yf.astype(jnp.bfloat16), w1_ref[...],
                     preferred_element_type=jnp.float32) + b1_ref[...]
        yf = _gelu_exact(yf)
        # TODO(synk): nn.Dropout is stochastic in training; inference identity here.
        yf = jnp.dot(yf.astype(jnp.bfloat16), w2_ref[...],
                     preferred_element_type=jnp.float32) + b2_ref[...]
        yf = _layernorm(yf, gf2_ref[...], bf2_ref[...])
        o_ref[...] = (yf + h_attn).reshape(bt, n, d).astype(o_ref.dtype)


def _head_kernel(h_ref, g_ref, b_ref, w_ref, bh_ref, o_ref):
    bt, n, d = h_ref.shape
    pooled = jnp.sum(h_ref[...].astype(jnp.float32), axis=1) * (1.0 / n)
    y = _layernorm(pooled, g_ref[...], b_ref[...])
    o_ref[...] = (jnp.dot(y.astype(jnp.bfloat16), w_ref[...],
                          preferred_element_type=jnp.float32)
                  + bh_ref[...]).astype(o_ref.dtype)


# ------------------------------ wrappers ---------------------------------------

def _const_spec(arr):
    zeros = (0,) * arr.ndim
    return pl.BlockSpec(arr.shape, lambda *_, z=zeros: z)


def _choose_batch_tile(batch, seq_len, cap_rows):
    cap = max(1, cap_rows // max(seq_len, 1))
    if batch >= 2:
        cap = min(cap, batch // 2)   # grid >= 2: pipelining + v7x megacore sharding
    bt = max(1, min(batch, cap))
    while batch % bt:
        bt -= 1
    return bt


def _choose_head_tile(batch, cap=32):
    for cand in range(min(batch, cap), 0, -1):
        if batch % cand == 0 and (cand % 8 == 0 or cand == batch):
            return cand
    return batch


def embed(x, params, pe):
    B, N, Din = x.shape
    D = params["emb_w"].shape[1]
    bt = _choose_batch_tile(B, N, ROW_CAP)
    x_spec = pl.BlockSpec((bt, N, Din), lambda b: (b, 0, 0))
    o_spec = pl.BlockSpec((bt, N, D), lambda b: (b, 0, 0))
    weights = (params["emb_ln0"][0], params["emb_ln0"][1],
               params["emb_w"], params["emb_b"],
               params["emb_ln1"][0], params["emb_ln1"][1], pe)
    return pl.pallas_call(
        _embed_kernel,
        grid=(B // bt,),
        in_specs=[x_spec] + [_const_spec(w) for w in weights],
        out_specs=o_spec,
        out_shape=jax.ShapeDtypeStruct((B, N, D), ACT_DTYPE),
        compiler_params=pltpu.CompilerParams(
            dimension_semantics=("parallel",), vmem_limit_bytes=VMEM_LIMIT),
    )(x, *weights)


def transformer_block(h, blk):
    B, N, D = h.shape
    assert N % 8 == 0, "seq len must be a multiple of 8 (16 preferred for bf16 packing)"
    heads = blk["wq"].shape[0]
    bt = _choose_batch_tile(B, N, ROW_CAP)
    h_spec = pl.BlockSpec((bt, N, D), lambda b, hd: (b, 0, 0))   # resident across heads
    weights = (blk["pre_ln"][0], blk["pre_ln"][1],
               blk["wq"], blk["wk"], blk["wv"], blk["wout"],
               blk["post_ln"][0], blk["post_ln"][1],
               blk["ff_ln1"][0], blk["ff_ln1"][1],
               blk["w1"], blk["b1"], blk["w2"], blk["b2"],
               blk["ff_ln2"][0], blk["ff_ln2"][1])
    return pl.pallas_call(
        _block_kernel,
        grid=(B // bt, heads),
        in_specs=[h_spec] + [_const_spec(w) for w in weights],
        out_specs=h_spec,
        out_shape=jax.ShapeDtypeStruct((B, N, D), ACT_DTYPE),
        scratch_shapes=[pltpu.VMEM((bt * N, D), jnp.bfloat16),   # pre-LN(x), reused per head
                        pltpu.VMEM((bt * N, D), jnp.float32)],   # attn out-proj accumulator
        compiler_params=pltpu.CompilerParams(
            dimension_semantics=("parallel", "arbitrary"),
            vmem_limit_bytes=VMEM_LIMIT),
    )(h, *weights)


def head(h, params):
    B, N, D = h.shape
    C = params["head_w"].shape[1]
    bt = _choose_head_tile(B)
    # TODO(synk): for large num_classes, pad C to a multiple of 128 lanes for unmasked stores.
    weights = (params["head_ln"][0], params["head_ln"][1],
               params["head_w"], params["head_b"])
    return pl.pallas_call(
        _head_kernel,
        grid=(B // bt,),
        in_specs=[pl.BlockSpec((bt, N, D), lambda i: (i, 0, 0))]
                 + [_const_spec(w) for w in weights],
        out_specs=pl.BlockSpec((bt, C), lambda i: (i, 0)),
        out_shape=jax.ShapeDtypeStruct((B, C), jnp.float32),
        compiler_params=pltpu.CompilerParams(
            dimension_semantics=("parallel",), vmem_limit_bytes=VMEM_LIMIT),
    )(h, *weights)


# ------------------------------ model (JAX glue) --------------------------------

def sinusoidal_pe(seq_len, dim, theta=10000.0):
    half = dim // 2
    freq_seq = jnp.arange(half, dtype=jnp.float32) / half
    inv_freq = theta ** (-freq_seq)
    emb = jnp.arange(seq_len, dtype=jnp.float32)[:, None] * inv_freq[None, :]
    return jnp.concatenate([jnp.sin(emb), jnp.cos(emb)], axis=-1)


def simple_vit_forward(params, x):
    B, N, _ = x.shape
    D = params["emb_w"].shape[1]
    pe = sinusoidal_pe(N, D) * params["pe_scale"]   # (N, D), no per-batch broadcast
    h = embed(x, params, pe)                        # bf16 (B, N, D)
    for blk in params["blocks"]:
        h = transformer_block(h, blk)               # fused attn + FF, bf16 in/out
    return head(h, params)                          # f32 logits (B, C)


# ------------------------------ parameter init -----------------------------------

def init_params(key, *, input_dim, attn_dim, num_classes, depth, heads,
                dim_head, mlp_dim):
    keys = iter(jax.random.split(key, 16 + depth * 16))

    def w(shape, scale=0.02):
        # matmul weights stored bf16 (MXU operand dtype); f32 accumulation in-kernel
        return (scale * jax.random.normal(next(keys), shape, jnp.float32)
                ).astype(jnp.bfloat16)

    def ln(d):
        return (jnp.ones((1, d), jnp.float32), jnp.zeros((1, d), jnp.float32))

    params = dict(
        emb_ln0=ln(input_dim),
        emb_w=w((input_dim, attn_dim)),
        emb_b=jnp.zeros((1, attn_dim), jnp.float32),
        emb_ln1=ln(attn_dim),
        pe_scale=jnp.asarray(attn_dim ** -0.5, jnp.float32),
        blocks=[],
        head_ln=ln(attn_dim),
        head_w=w((attn_dim, num_classes)),
        head_b=jnp.zeros((1, num_classes), jnp.float32),
    )
    sm_scale = 1.0 / math.sqrt(dim_head)
    for _ in range(depth):
        # Per-head layout: wq/wk/wv (heads, D, dh), wout (heads, dh, D) — host-side
        # re-layout of the PyTorch to_qkv / to_out column blocks (bias=False), so the
        # kernel indexes the leading head axis instead of slicing lanes.  The SDPA
        # 1/sqrt(dh) scale is folded into wq before the bf16 cast.
        wq = (sm_scale * 0.02
              * jax.random.normal(next(keys), (heads, attn_dim, dim_head), jnp.float32)
              ).astype(jnp.bfloat16)
        params["blocks"].append(dict(
            pre_ln=ln(attn_dim),
            wq=wq,
            wk=w((heads, attn_dim, dim_head)),
            wv=w((heads, attn_dim, dim_head)),
            wout=w((heads, dim_head, attn_dim)),
            post_ln=ln(attn_dim),
            ff_ln1=ln(attn_dim),
            w1=w((attn_dim, mlp_dim)),
            b1=jnp.zeros((1, mlp_dim), jnp.float32),
            w2=w((mlp_dim, attn_dim)),
            b2=jnp.zeros((1, attn_dim), jnp.float32),
            ff_ln2=ln(attn_dim),
        ))
    return params


# ------------------------------ main ----------------------------------------------

if __name__ == "__main__":
    key = jax.random.PRNGKey(0)
    pkey, xkey = jax.random.split(key)

    B, N, input_dim = 2, 16, 16
    attn_dim, num_classes, depth = 32, 4, 2
    heads, dim_head, mlp_dim = 2, 16, 64

    params = init_params(pkey, input_dim=input_dim, attn_dim=attn_dim,
                         num_classes=num_classes, depth=depth, heads=heads,
                         dim_head=dim_head, mlp_dim=mlp_dim)
    x = jax.random.normal(xkey, (B, N, input_dim), jnp.float32)

    out = jax.block_until_ready(simple_vit_forward(params, x))
    assert out.shape == (B, num_classes)
    assert bool(jnp.all(jnp.isfinite(out)))
    print("KERNEL_OK")
</pallas_src>

<mosaic_0001>
module attributes {stable_mosaic.version = 11 : i64} {
  func.func @_embed_kernel(%arg0: i32, %arg1: memref<1x16x16xf32, #tpu.memory_space<vmem>>, %arg2: memref<1x16xf32, #tpu.memory_space<vmem>>, %arg3: memref<1x16xf32, #tpu.memory_space<vmem>>, %arg4: memref<16x32xbf16, #tpu.memory_space<vmem>>, %arg5: memref<1x32xf32, #tpu.memory_space<vmem>>, %arg6: memref<1x32xf32, #tpu.memory_space<vmem>>, %arg7: memref<1x32xf32, #tpu.memory_space<vmem>>, %arg8: memref<16x32xf32, #tpu.memory_space<vmem>>, %arg9: memref<1x16x32xbf16, #tpu.memory_space<vmem>>) attributes {dimension_semantics = [#tpu.dimension_semantics<parallel>], iteration_bounds = array<i64: 2>, scalar_prefetch = 0 : i64, scratch_operands = 0 : i64, tpu.core_type = #tpu.core_type<tc>, window_params = [{transform_indices = @transform_0, window_bounds = array<i64: 1, 16, 16>}, {pipeline_mode = #tpu.pipeline_mode<synchronous>, transform_indices = @transform_1, window_bounds = array<i64: 1, 16>}, {pipeline_mode = #tpu.pipeline_mode<synchronous>, transform_indices = @transform_2, window_bounds = array<i64: 1, 16>}, {pipeline_mode = #tpu.pipeline_mode<synchronous>, transform_indices = @transform_3, window_bounds = array<i64: 16, 32>}, {pipeline_mode = #tpu.pipeline_mode<synchronous>, transform_indices = @transform_4, window_bounds = array<i64: 1, 32>}, {pipeline_mode = #tpu.pipeline_mode<synchronous>, transform_indices = @transform_5, window_bounds = array<i64: 1, 32>}, {pipeline_mode = #tpu.pipeline_mode<synchronous>, transform_indices = @transform_6, window_bounds = array<i64: 1, 32>}, {pipeline_mode = #tpu.pipeline_mode<synchronous>, transform_indices = @transform_7, window_bounds = array<i64: 16, 32>}, {transform_indices = @transform_8, window_bounds = array<i64: 1, 16, 32>}]} {
    %c0 = arith.constant 0 : index
    %c0_0 = arith.constant 0 : index
    %c0_1 = arith.constant 0 : index
    %0 = vector.load %arg1[%c0, %c0_0, %c0_1] : memref<1x16x16xf32, #tpu.memory_space<vmem>>, vector<1x16x16xf32>
    %1 = vector.shape_cast %0 : vector<1x16x16xf32> to vector<16x16xf32>
    %c0_2 = arith.constant 0 : index
    %c0_3 = arith.constant 0 : index
    %2 = vector.load %arg2[%c0_2, %c0_3] : memref<1x16xf32, #tpu.memory_space<vmem>>, vector<1x16xf32>
    %c0_4 = arith.constant 0 : index
    %c0_5 = arith.constant 0 : index
    %3 = vector.load %arg3[%c0_4, %c0_5] : memref<1x16xf32, #tpu.memory_space<vmem>>, vector<1x16xf32>
    %cst = arith.constant dense<0.000000e+00> : vector<16xf32>
    %4 = vector.multi_reduction <add>, %1, %cst [1] : vector<16x16xf32> to vector<16xf32>
    %5 = vector.shape_cast %4 : vector<16xf32> to vector<16x1xf32>
    %cst_6 = arith.constant 1.600000e+01 : f32
    %6 = vector.broadcast %cst_6 : f32 to vector<16x1xf32>
    %7 = arith.divf %5, %6 : vector<16x1xf32>
    %8 = vector.broadcast %7 : vector<16x1xf32> to vector<16x16xf32>
    %9 = arith.subf %1, %8 : vector<16x16xf32>
    %10 = arith.mulf %9, %9 : vector<16x16xf32>
    %cst_7 = arith.constant dense<0.000000e+00> : vector<16xf32>
    %11 = vector.multi_reduction <add>, %10, %cst_7 [1] : vector<16x16xf32> to vector<16xf32>
    %12 = vector.shape_cast %11 : vector<16xf32> to vector<16x1xf32>
    %cst_8 = arith.constant 1.600000e+01 : f32
    %13 = vector.broadcast %cst_8 : f32 to vector<16x1xf32>
    %14 = arith.divf %12, %13 : vector<16x1xf32>
    %cst_9 = arith.constant 9.99999974E-6 : f32
    %15 = vector.broadcast %cst_9 : f32 to vector<16x1xf32>
    %16 = arith.addf %14, %15 : vector<16x1xf32>
    %17 = math.rsqrt %16 : vector<16x1xf32>
    %18 = vector.broadcast %17 : vector<16x1xf32> to vector<16x16xf32>
    %19 = arith.mulf %9, %18 : vector<16x16xf32>
    %20 = vector.broadcast %2 : vector<1x16xf32> to vector<16x16xf32>
    %21 = arith.mulf %19, %20 : vector<16x16xf32>
    %22 = vector.broadcast %3 : vector<1x16xf32> to vector<16x16xf32>
    %23 = arith.addf %21, %22 : vector<16x16xf32>
    %24 = arith.truncf %23 : vector<16x16xf32> to vector<16x16xbf16>
    %c0_10 = arith.constant 0 : index
    %c0_11 = arith.constant 0 : index
    %25 = vector.load %arg4[%c0_10, %c0_11] : memref<16x32xbf16, #tpu.memory_space<vmem>>, vector<16x32xbf16>
    %cst_12 = arith.constant dense<0.000000e+00> : vector<16x32xf32>
    %26 = tpu.matmul %24, %25, %cst_12 {dimension_numbers = #tpu.dot_dimension_numbers<[1], [0], [0], [1], [0, 0, 1, 1], [], []>} : vector<16x16xbf16>, vector<16x32xbf16>, vector<16x32xf32> -> vector<16x32xf32>
    %c0_13 = arith.constant 0 : index
    %c0_14 = arith.constant 0 : index
    %27 = vector.load %arg5[%c0_13, %c0_14] : memref<1x32xf32, #tpu.memory_space<vmem>>, vector<1x32xf32>
    %28 = vector.broadcast %27 : vector<1x32xf32> to vector<16x32xf32>
    %29 = arith.addf %26, %28 : vector<16x32xf32>
    %c0_15 = arith.constant 0 : index
    %c0_16 = arith.constant 0 : index
    %30 = vector.load %arg6[%c0_15, %c0_16] : memref<1x32xf32, #tpu.memory_space<vmem>>, vector<1x32xf32>
    %c0_17 = arith.constant 0 : index
    %c0_18 = arith.constant 0 : index
    %31 = vector.load %arg7[%c0_17, %c0_18] : memref<1x32xf32, #tpu.memory_space<vmem>>, vector<1x32xf32>
    %cst_19 = arith.constant dense<0.000000e+00> : vector<16xf32>
    %32 = vector.multi_reduction <add>, %29, %cst_19 [1] : vector<16x32xf32> to vector<16xf32>
    %33 = vector.shape_cast %32 : vector<16xf32> to vector<16x1xf32>
    %cst_20 = arith.constant 3.200000e+01 : f32
    %34 = vector.broadcast %cst_20 : f32 to vector<16x1xf32>
    %35 = arith.divf %33, %34 : vector<16x1xf32>
    %36 = vector.broadcast %35 : vector<16x1xf32> to vector<16x32xf32>
    %37 = arith.subf %29, %36 : vector<16x32xf32>
    %38 = arith.mulf %37, %37 : vector<16x32xf32>
    %cst_21 = arith.constant dense<0.000000e+00> : vector<16xf32>
    %39 = vector.multi_reduction <add>, %38, %cst_21 [1] : vector<16x32xf32> to vector<16xf32>
    %40 = vector.shape_cast %39 : vector<16xf32> to vector<16x1xf32>
    %cst_22 = arith.constant 3.200000e+01 : f32
    %41 = vector.broadcast %cst_22 : f32 to vector<16x1xf32>
    %42 = arith.divf %40, %41 : vector<16x1xf32>
    %cst_23 = arith.constant 9.99999974E-6 : f32
    %43 = vector.broadcast %cst_23 : f32 to vector<16x1xf32>
    %44 = arith.addf %42, %43 : vector<16x1xf32>
    %45 = math.rsqrt %44 : vector<16x1xf32>
    %46 = vector.broadcast %45 : vector<16x1xf32> to vector<16x32xf32>
    %47 = arith.mulf %37, %46 : vector<16x32xf32>
    %48 = vector.broadcast %30 : vector<1x32xf32> to vector<16x32xf32>
    %49 = arith.mulf %47, %48 : vector<16x32xf32>
    %50 = vector.broadcast %31 : vector<1x32xf32> to vector<16x32xf32>
    %51 = arith.addf %49, %50 : vector<16x32xf32>
    %52 = vector.shape_cast %51 : vector<16x32xf32> to vector<1x16x32xf32>
    %c0_24 = arith.constant 0 : index
    %c0_25 = arith.constant 0 : index
    %53 = vector.load %arg8[%c0_24, %c0_25] : memref<16x32xf32, #tpu.memory_space<vmem>>, vector<16x32xf32>
    %54 = vector.shape_cast %53 : vector<16x32xf32> to vector<1x16x32xf32>
    %55 = arith.addf %52, %54 : vector<1x16x32xf32>
    %56 = arith.truncf %55 : vector<1x16x32xf32> to vector<1x16x32xbf16>
    %c0_26 = arith.constant 0 : index
    %c0_27 = arith.constant 0 : index
    %c0_28 = arith.constant 0 : index
    %57 = vector.load %arg9[%c0_26, %c0_27, %c0_28] : memref<1x16x32xbf16, #tpu.memory_space<vmem>>, vector<1x16x32xbf16>
    tpu.vector_store %arg9[%c0_26, %c0_27, %c0_28], %56 {strides = array<i32>} : memref<1x16x32xbf16, #tpu.memory_space<vmem>>, vector<1x16x32xbf16>,
    return
  }
  func.func @transform_0(%arg0: i32) -> (i32, i32, i32) {
    %c0_i32 = arith.constant 0 : i32
    %c0_i32_0 = arith.constant 0 : i32
    %c0_i32_1 = arith.constant 0 : i32
    return %arg0, %c0_i32, %c0_i32_0 : i32, i32, i32
  }
  func.func @transform_1(%arg0: i32) -> (i32, i32) {
    %c0_i32 = arith.constant 0 : i32
    %c0_i32_0 = arith.constant 0 : i32
    %c0_i32_1 = arith.constant 0 : i32
    return %c0_i32, %c0_i32_0 : i32, i32
  }
  func.func @transform_2(%arg0: i32) -> (i32, i32) {
    %c0_i32 = arith.constant 0 : i32
    %c0_i32_0 = arith.constant 0 : i32
    %c0_i32_1 = arith.constant 0 : i32
    return %c0_i32, %c0_i32_0 : i32, i32
  }
  func.func @transform_3(%arg0: i32) -> (i32, i32) {
    %c0_i32 = arith.constant 0 : i32
    %c0_i32_0 = arith.constant 0 : i32
    %c0_i32_1 = arith.constant 0 : i32
    return %c0_i32, %c0_i32_0 : i32, i32
  }
  func.func @transform_4(%arg0: i32) -> (i32, i32) {
    %c0_i32 = arith.constant 0 : i32
    %c0_i32_0 = arith.constant 0 : i32
    %c0_i32_1 = arith.constant 0 : i32
    return %c0_i32, %c0_i32_0 : i32, i32
  }
  func.func @transform_5(%arg0: i32) -> (i32, i32) {
    %c0_i32 = arith.constant 0 : i32
    %c0_i32_0 = arith.constant 0 : i32
    %c0_i32_1 = arith.constant 0 : i32
    return %c0_i32, %c0_i32_0 : i32, i32
  }
  func.func @transform_6(%arg0: i32) -> (i32, i32) {
    %c0_i32 = arith.constant 0 : i32
    %c0_i32_0 = arith.constant 0 : i32
    %c0_i32_1 = arith.constant 0 : i32
    return %c0_i32, %c0_i32_0 : i32, i32
  }
  func.func @transform_7(%arg0: i32) -> (i32, i32) {
    %c0_i32 = arith.constant 0 : i32
    %c0_i32_0 = arith.constant 0 : i32
    %c0_i32_1 = arith.constant 0 : i32
    return %c0_i32, %c0_i32_0 : i32, i32
  }
  func.func @transform_8(%arg0: i32) -> (i32, i32, i32) {
    %c0_i32 = arith.constant 0 : i32
    %c0_i32_0 = arith.constant 0 : i32
    %c0_i32_1 = arith.constant 0 : i32
    return %arg0, %c0_i32, %c0_i32_0 : i32, i32, i32
  }
}

</mosaic_0001>

<bundles_post_ra>
// kernel: tpu_custom_call.1
= control target key start
LH: loop header
LB: loop body
LE: loop exit
PB: predicated region body
PF: predicated region fallthrough
CT: control target
= control target key end

     0   :  { %13 = vsyncpa [#allocation3], 0  ;;  %s1310_s0 = inlined_call_operand.hbm [shape: f32[2,16,16], index: 0, kind: input, shape index: {}]   ;;  %s1311_s1 = inlined_call_operand.vmem [shape: f32[1,16], index: 1, kind: input, shape index: {}]   ;;  %s1312_s2 = inlined_call_operand.vmem [shape: f32[1,16], index: 2, kind: input, shape index: {}]   ;;  %s1313_s3 = inlined_call_operand.vmem [shape: bf16[16,32], index: 3, kind: input, shape index: {}]   ;;  %s1314_s4 = inlined_call_operand.hbm [shape: f32[1,32], index: 4, kind: input, shape index: {}]   ;;  %s1315_s5 = inlined_call_operand.hbm [shape: f32[1,32], index: 5, kind: input, shape index: {}]   ;;  %s1316_s6 = inlined_call_operand.hbm [shape: f32[1,32], index: 6, kind: input, shape index: {}]   ;;  %s1317_s7 = inlined_call_operand.vmem [shape: f32[16,32], index: 7, kind: input, shape index: {}]   ;;  %s1318_s8 = inlined_call_operand.hbm [shape: bf16[2,16,32], index: 8, kind: output, shape index: {}]  }
   0x1   :  { %15 = vsyncpa [#allocation3 + $0x1], 0 }
   0x2   :  { %16 = vsyncpa [#allocation6], 0 }
   0x3   :  { %17 = vsyncpa [#allocation9], 0 }
   0x4   :  { %18 = vsyncpa [#allocation4], 0 }
   0x5   :  { %20 = vsyncpa [#allocation4 + $0x1], 0  ;;  %s1027_s27 = smov 0   ;;  %s1029_s28 = smov 0  }
   0x6   :  { %s1031_s29 = smov 0   ;;  %s1033_s30 = smov 0  }
   0x7 LB: > { %s1048_s9 = sadd.s32 4294967295, %s969_s30   ;;  %s648_s10 = sadd.s32 4294967294, %s969_s30   ;;  %s969_s30 = sphi %s1033_s30, %s1341_s30   ;;  %s965_s29 = sphi %s1031_s29, %s1340_s29   ;;  %s961_s28 = sphi %s1029_s28, %s1339_s28   ;;  %s957_s27 = sphi %s1027_s27, %s1338_s27  }
   0x8   : > { %p46_p0 = scmp.ne.s32.totalorder %s961_s28, %s957_s27  ;;  %p1319_p1 = scmp.eq.s32.totalorder %s1048_s9, 0 }
   0x9   : > { %p223_p3 = scmp.eq.s32.totalorder %s648_s10, 1  ;;  %p649_p5 = scmp.ge.s32.totalorder %s969_s30, 1 }
   0xa   : > { %p1057_p4 = por %p1319_p1, %p46_p0  ;;  %p230_p7 = scmp.lt.s32.totalorder %s969_s30, 3 }
   0xb   : > { %p1062_p6 = por %p223_p3, %p46_p0  ;;  %s971_s14 = smov [#allocation5]  }
   0xc   : > { %s1322_s11 = scalar_select %p1057_p4, 1, 0 }
   0xd   : > { %s1323_s12 = scalar_select %p1062_p6, 1, 0 }
   0xe   : > { %p1067_p8 = pnand %p649_p5, %p230_p7  ;;  %s252_s15 = sshll.u32 %s971_s14, 4  ;;  %s253_s15 = int_to_ptr.vmem [resolvable:$true] %s252_s15 }
   0xf   : > { %s972_s16 = smov [#allocation7]   ;;  %s973_s19 = smov [#allocation8]  }
  0x10   : > { %s1324_s13 = scalar_select %p1067_p8, 1, 0 }
  0x11   : > { %p705_p10 = pneg %p1067_p8  ;;  %s263_s17 = sshll.u32 %s972_s16, 4  ;;  %s1080_s17 = int_to_ptr.vmem [resolvable:$true] %s263_s17 }
  0x12   : > { %s274_s20 = sshll.u32 %s973_s19, 4  ;;  %s781_s23 = scalar_lea.hbm %s1314_s4, 16  ;;  %s1082_s20 = int_to_ptr.vmem [resolvable:$true] %s274_s20 }
  0x13   : > { %p1076_p11 = pnand %p705_p10, %p1319_p1  ;;  %p782_p12 = scmp.ne.s32.totalorder %s1314_s4, %s781_s23 }
  0x14   : > { %p788_p5 = scmp.lt.u32.totalorder %s781_s23, %s1314_s4 }
  0x15   : > { %p1092_p13 = pneg %p1076_p11 }
  0x17   : > { %p784_p0 = pnand %p1092_p13, %p782_p12 }
  0x19   : > { %p785_p3 = pneg %p784_p0 }
  0x1b   : > { %p790_p7 = pnand %p788_p5, %p785_p3 }
  0x1d   : > { %793 = shalt.err (!%p790_p7)
}
  0x1e   : > { %s794_s16 = scalar_lea.vmem %s253_s15, 16  ;;  %s801_s19 = scalar_lea.vmem %s253_s15, 32 }
  0x1f   : > { %p795_p10 = scmp.ne.s32.totalorder %s253_s15, %s794_s16  ;;  %p802_p2 = scmp.lt.s32.totalorder %s253_s15, %s253_s15 }
  0x20   : > { %p803_p6 = scmp.lt.s32.totalorder %s801_s19, %s794_s16 }
  0x21   : > { %p797_p9 = pnand %p795_p10, %p1092_p13 }
  0x22   : > { %p804_p4 = por %p803_p6, %p802_p2 }
  0x23   : > { %p798_p1 = pneg %p797_p9 }
  0x25   : > { %p805_p8 = pnand %p804_p4, %p798_p1 }
  0x27   : > { %808 = shalt.err (!%p805_p8)
}
  0x28   : > { %708 = dma.hbm_to_vmem [thread:$0]  (!%p1076_p11), %s1314_s4, 16, %s253_s15, [#allocation6]  }
  0x29   : > { %s809_s25 = scalar_lea.hbm %s1315_s5, 16 }
  0x2a   : > { %p810_p9 = scmp.ne.s32.totalorder %s1315_s5, %s809_s25  ;;  %p816_p1 = scmp.lt.u32.totalorder %s809_s25, %s1315_s5 }
  0x2c   : > { %p812_p12 = pnand %p810_p9, %p1092_p13 }
  0x2e   : > { %p813_p2 = pneg %p812_p12 }
  0x30   : > { %p818_p4 = pnand %p816_p1, %p813_p2 }
  0x32   : > { %821 = shalt.err (!%p818_p4)
}
  0x33   : > { %s822_s15 = scalar_lea.vmem %s1080_s17, 16  ;;  %s829_s21 = scalar_lea.vmem %s1080_s17, 32 }
  0x34   : > { %p823_p6 = scmp.ne.s32.totalorder %s1080_s17, %s822_s15  ;;  %p830_p3 = scmp.lt.s32.totalorder %s1080_s17, %s1080_s17 }
  0x35   : > { %p831_p5 = scmp.lt.s32.totalorder %s829_s21, %s822_s15 }
  0x36   : > { %p825_p8 = pnand %p823_p6, %p1092_p13 }
  0x37   : > { %p832_p7 = por %p831_p5, %p830_p3 }
  0x38   : > { %p826_p0 = pneg %p825_p8 }
  0x3a   : > { %p833_p10 = pnand %p832_p7, %p826_p0 }
  0x3c   : > { %836 = shalt.err (!%p833_p10)
}
  0x3d   : > { %711 = dma.hbm_to_vmem [thread:$0]  (!%p1076_p11), %s1315_s5, 16, %s1080_s17, [#allocation6]  }
  0x3e   : > { %s837_s10 = scalar_lea.hbm %s1316_s6, 16 }
  0x3f   : > { %p838_p9 = scmp.ne.s32.totalorder %s1316_s6, %s837_s10  ;;  %p844_p1 = scmp.lt.u32.totalorder %s837_s10, %s1316_s6 }
  0x41   : > { %p840_p12 = pnand %p838_p9, %p1092_p13 }
  0x43   : > { %p841_p2 = pneg %p840_p12 }
  0x45   : > { %p846_p4 = pnand %p844_p1, %p841_p2 }
  0x47   : > { %849 = shalt.err (!%p846_p4)
}
  0x48   : > { %s850_s17 = scalar_lea.vmem %s1082_s20, 16  ;;  %s857_s21 = scalar_lea.vmem %s1082_s20, 32 }
  0x49   : > { %p851_p6 = scmp.ne.s32.totalorder %s1082_s20, %s850_s17  ;;  %p858_p3 = scmp.lt.s32.totalorder %s1082_s20, %s1082_s20 }
  0x4a   : > { %p859_p5 = scmp.lt.s32.totalorder %s857_s21, %s850_s17 }
  0x4b   : > { %p853_p8 = pnand %p851_p6, %p1092_p13 }
  0x4c   : > { %p860_p7 = por %p859_p5, %p858_p3 }
  0x4d   : > { %p854_p0 = pneg %p853_p8 }
  0x4f   : > { %p861_p10 = pnand %p860_p7, %p854_p0 }
  0x51   : > { %864 = shalt.err (!%p861_p10)
}
  0x52   : > { %714 = dma.hbm_to_vmem [thread:$0]  (!%p1076_p11), %s1316_s6, 16, %s1082_s20, [#allocation9]  }
  0x53   : > { %s1157_s26 = sadd.s32 1, %s969_s30   ;;  %s33_s24 = sadd.s32 1, %s965_s29 }
  0x54   : > { %s30_s18 = ssub.s32 %s969_s30, %s1157_s26  ;;  %p40_p9 = scmp.ne.s32.totalorder %s965_s29, %s961_s28 }
  0x55   : > { %p31_p13 = scmp.eq.s32.totalorder %s30_s18, 0  ;;  %p41_p12 = scmp.eq.s32.totalorder %s969_s30, 0 }
  0x56   : > { %p726_p2 = scmp.lt.s32.totalorder %s969_s30, 2  ;;  %p1327_p4 = scmp.eq.s32.totalorder %s1048_s9, 1 }
  0x57   : > { %s1167_s25 = scalar_select %p31_p13, %s965_s29, %s33_s24  }
  0x58   : > { %p42_p1 = por %p41_p12, %p40_p9  ;;  %p1171_p6 = por %p1327_p4, %p40_p9 }
  0x59   : > { %s288_s14 = sand.u32 1, %s965_s29   ;;  %s677_s16 = sshll.u32 %s969_s30, 8 }
  0x5a   : > { %s654_s20 = sshll.u32 %s288_s14, 4  ;;  %s1180_s17 = scalar_lea.hbm %s1310_s0, %s677_s16 }
  0x5b   : > { %s292_s21 = scalar_lea.vmem [#allocation2], %s654_s20  ;;  %p1182_p11 = pnand %p726_p2, %p42_p1 }
  0x5c   : > { %s299_s22 = sshll.u32 %s292_s21, 4  ;;  %s1188_s18 = scalar_lea.sflag [#allocation3], %s288_s14  ;;  %s1186_s22 = int_to_ptr.vmem [resolvable:$true] %s299_s22 }
  0x5d   : > { %s865_s24 = scalar_lea.hbm %s1180_s17, 256  ;;  %p867_p0 = pneg %p1182_p11 }
  0x5e   : > { %p866_p8 = scmp.ne.s32.totalorder %s1180_s17, %s865_s24  ;;  %s870_s19 = scalar_lea.hbm %s1310_s0, 512 }
  0x5f   : > { %p871_p7 = scmp.lt.u32.totalorder %s1180_s17, %s1310_s0  ;;  %p872_p10 = scmp.lt.u32.totalorder %s870_s19, %s865_s24 }
  0x60   : > { %p868_p3 = pnand %p867_p0, %p866_p8  ;;  %p874_p9 = scmp.lt.u32.totalorder %s865_s24, %s1180_s17 }
  0x61   : > { %p873_p13 = por %p872_p10, %p871_p7 }
  0x62   : > { %p869_p5 = pneg %p868_p3 }
  0x63   : > { %p875_p12 = por %p874_p9, %p873_p13 }
  0x65   : > { %p876_p2 = pnand %p875_p12, %p869_p5 }
  0x67   : > { %879 = shalt.err (!%p876_p2)
}
  0x68   : > { %s880_s14 = scalar_lea.vmem %s1186_s22, 256  ;;  %s974_s16 = smov [#allocation2]  }
  0x69   : > { %p881_p1 = scmp.ne.s32.totalorder %s1186_s22, %s880_s14  ;;  %s885_s20 = sshll.u32 %s974_s16, 4  ;;  %s886_s20 = int_to_ptr.vmem [resolvable:$false] %s885_s20 }
  0x6a   : > { %s887_s15 = scalar_lea.vmem %s886_s20, 512  ;;  %p888_p3 = scmp.lt.s32.totalorder %s1186_s22, %s886_s20 }
  0x6b   : > { %p883_p4 = pnand %p881_p1, %p867_p0  ;;  %p889_p7 = scmp.lt.s32.totalorder %s887_s15, %s880_s14 }
  0x6d   : > { %p884_p8 = pneg %p883_p4  ;;  %p890_p10 = por %p889_p7, %p888_p3 }
  0x6f   : > { %p891_p13 = pnand %p890_p10, %p884_p8 }
  0x71   : > { %894 = shalt.err (!%p891_p13)
}
  0x72   : > { %s975_s24 = smov 128   ;;  %s976_s19 = smov 8  }
  0x73   : > { %718 = dma.hbm_to_vmem [thread:$0]  (!%p1182_p11), %s1180_s17, 256, %s1186_s22, %s1188_s18, %s975_s24, %s975_s24, %s976_s19  }
  0x74   : > { %p1330_p0 = scmp.ne.s32.totalorder %s1324_s13, 0 }
  0x75   : > { %s1219_s21 = sand.u32 (!%p1330_p0), 1, %s961_s28   ;;  %p1331_p5 = scmp.ne.s32.totalorder (!%p1330_p0), %s1322_s11, 0 }
  0x76   : > { %311 = sbr.rel (%p1330_p0) target bundleno = 1000 (0x3e8), region = 52  ;;  %s658_s14 = sshll.u32 (!%p1330_p0), %s1219_s21, 4 }
  0x77   : > { %s314_s16 = scalar_lea.sflag (!%p1330_p0), [#allocation3], %s1219_s21  ;;  %s317_s20 = scalar_lea.vmem (!%p1330_p0), [#allocation2], %s658_s14 }
  0x7d   : > { %940 = dma.done.wait (%p1331_p5), %s314_s16, 256  }
  0x7e   : > { %942 = vsyncadd (%p1331_p5), %s314_s16, 4294967040  ;;  %p1332_p9 = scmp.eq.s32.totalorder %s1048_s9, 0 }
  0x80   : > { %944 = dma.done.wait (%p1332_p9), [#allocation6], 32   ;;  %p1333_p11 = pmov %p1332_p9 }
  0x81   : > { %p1334_p12 = pmov %p1332_p9 }
  0x82   : > { %946 = vsyncadd (%p1333_p11), [#allocation6], 4294967264 }
  0x83   : > { %948 = dma.done.wait (%p1334_p12), [#allocation9], 16   ;;  %p1335_p2 = pmov %p1332_p9 }
  0x84   : > { %vm367_vm0 = vcmask 130048   ;;  %v363_v0 = vld [vmem:[%s317_s20] sm:$0xff]  ;;  %v364_v1 = vld [vmem:[%s317_s20 + $0x8] sm:$0xff]  ;;  %v977_v15 = vmov 0.0   ;;  %vm978_vm1 = vmmov 0   ;;  %vm473_vm2 = vcmask 261120  }
  0x85   : > { %950 = vsyncadd (%p1335_p2), [#allocation9], 4294967280  ;;  %v368_v2 = vsel %vm367_vm0, %v363_v0, 0.0  ;;  %v371_v3 = vsel %vm367_vm0, %v364_v1, 0.0  ;;  %v772_v14 = vld [vmem:[%s1313_s3] sm:$0xff]   ;;  %683 = vmatprep.subr.bf16.mxu0 %v977_v15  ;;  %685 = vmatprep.mubr.msk.bf16.mxu0 %vm978_vm1, %v977_v15  ;;  %s662_s15 = sshll.u32 %s1219_s21, 3 }
  0x86   : > { %369 = vadd.xlane.f32.xlu0 %v368_v2  ;;  %684 = vmatpush3.bf16.msra.mxu0 %v772_v14  ;;  %v663_v24 = vld [vmem:[%s1311_s1] ss:$0 sm:$0xff]  ;;  %v668_v59 = vld [vmem:[#allocation7] ss:$0 sm:$0xff]  ;;  %v669_v62 = vld [vmem:[#allocation8] ss:$0 sm:$0xff] }
  0x87   : > { %v664_v28 = vld [vmem:[%s1312_s2] ss:$0 sm:$0xff]  ;;  %s680_s20 = sshll.u32 %s1048_s9, 7  ;;  %s361_s11 = scalar_lea.vmem [#allocation10], %s662_s15  ;;  %vm529_vm3 = vcmask 257024  }
  0x88   : > { %v665_v33 = vld [vmem:[#allocation5] ss:$0 sm:$0xff]  ;;  %s546_s13 = sshll.u32 %s361_s11, 4  ;;  %s1264_s23 = scalar_lea.hbm %s1318_s8, %s680_s20  ;;  %s1266_s13 = int_to_ptr.vmem [resolvable:$true] %s546_s13 }
  0x89   : > { %s533_s18 = scalar_lea.sflag [#allocation4], %s1219_s21  ;;  %s895_s9 = scalar_lea.vmem %s1266_s13, 128 }
  0x8a   : > { %372 = vadd.xlane.f32.xlu0 %v371_v3  ;;  %p896_p1 = scmp.ne.s32.totalorder %s1266_s13, %s895_s9  ;;  %s979_s15 = smov [#allocation10]  }
  0x8b   : > { %s899_s24 = sshll.u32 %s979_s15, 4  ;;  %s900_s24 = int_to_ptr.vmem [resolvable:$false] %s899_s24 }
  0x8c   : > { %p897_p4 = pnand %p896_p1, %p1171_p6  ;;  %s901_s19 = scalar_lea.vmem %s900_s24, 256 }
  0x8d   : > { %p902_p3 = scmp.lt.s32.totalorder %s1266_s13, %s900_s24  ;;  %p903_p7 = scmp.lt.s32.totalorder %s901_s19, %s895_s9 }
  0x8e   : > { %p898_p8 = pneg %p897_p4 }
  0x8f   : > { %p904_p10 = por %p903_p7, %p902_p3 }
  0x91   : > { %p905_p13 = pnand %p904_p10, %p898_p8 }
 0x113   : > { %v370_v4 = vpop.xlane.xlu0 %369 }
 0x114   : > { %v375_v5 = vmul.f32 0.0625, %v370_v4  ;;  %v518_v4 = vld [vmem:[%s1317_s7 + $0x8] sm:$0xff] }
 0x116   : > { %v377_v6 = vsub.f32 %v363_v0, %v375_v5 }
 0x117   : > { %v373_v7 = vpop.xlane.xlu0 %372 }
 0x118   : > { %v376_v8 = vmul.f32 0.0625, %v373_v7  ;;  %v379_v9 = vmul.f32 %v377_v6, %v377_v6 }
 0x11a   : > { %v378_v10 = vsub.f32 %v364_v1, %v376_v8  ;;  %v381_v11 = vsel %vm367_vm0, %v379_v9, 0.0  ;;  %v517_v1 = vld [vmem:[%s1317_s7] sm:$0xff] }
 0x11b   : > { %382 = vadd.xlane.f32.xlu1 %v381_v11 }
 0x11c   : > { %v380_v12 = vmul.f32 %v378_v10, %v378_v10 }
 0x11e   : > { %v384_v13 = vsel %vm367_vm0, %v380_v12, 0.0 }
 0x11f   : > { %385 = vadd.xlane.f32.xlu1 %v384_v13 }
 0x1a8   : > { %v383_v16 = vpop.xlane.xlu1 %382 }
 0x1a9   : > { %v387_v17 = vmul.f32 0.0625, %v383_v16 }
 0x1ab   : > { %v389_v18 = vadd.f32 1e-05, %v387_v17 }
 0x1ac   : > { %v386_v19 = vpop.xlane.xlu1 %385 }
 0x1ad   : > { %773 = vrsqrt.f32 %v389_v18  ;;  %v388_v20 = vmul.f32 0.0625, %v386_v19 }
 0x1af   : > { %v390_v21 = vadd.f32 1e-05, %v388_v20 }
 0x1b1   : > { %775 = vrsqrt.f32 %v390_v21 }
 0x1b7   : > { %v774_v22 = vpop.eup %773 }
 0x1b8   : > { %v393_v23 = vmul.f32 %v774_v22, %v377_v6 }
 0x1ba   : > { %v401_v27 = vmul.f32 %v663_v24, %v393_v23 }
 0x1bb   : > { %v776_v25 = vpop.eup %775 }
 0x1bc   : > { %v394_v26 = vmul.f32 %v776_v25, %v378_v10  ;;  %v409_v30 = vadd.f32 %v664_v28, %v401_v27 }
 0x1be   : > { %v402_v29 = vmul.f32 %v663_v24, %v394_v26 }
 0x1c0   : > { %v410_v31 = vadd.f32 %v664_v28, %v402_v29 }
 0x1c2   : > { %v411_v32 = vpack.c.bf16 %v410_v31, %v409_v30 }
 0x1c4   : > { %686 = vmatmul.mubr.msk.bf16.vlgmr.msra.gmra.mrb[0].mxu0 %vm367_vm0, %v411_v32 }
 0x297   : > { %v464_v34 = vpop.f32.mrb[0].mxu0 }
 0x298   : > { %v465_v35 = vadd.f32 %v665_v33, %v464_v34  ;;  %v687_v36 = vpop.f32.mrb[1].mxu0 }
 0x299   : > { %v467_v37 = vpop.f32.mrb[2].mxu0 }
 0x29a   : > { %v468_v38 = vadd.f32 %v665_v33, %v467_v37  ;;  %v688_v39 = vpop.f32.mrb[3].mxu0  ;;  %v474_v40 = vsel %vm473_vm2, %v465_v35, 0.0 }
 0x29b   : > { %475 = vadd.xlane.f32.xlu0 %v474_v40 }
 0x29c   : > { %v477_v41 = vsel %vm473_vm2, %v468_v38, 0.0 }
 0x29d   : > { %478 = vadd.xlane.f32.xlu1 %v477_v41 }
 0x328   : > { %v476_v42 = vpop.xlane.xlu0 %475 }
 0x329   : > { %v481_v43 = vmul.f32 0.03125, %v476_v42 }
 0x32a   : > { %v479_v44 = vpop.xlane.xlu1 %478 }
 0x32b   : > { %v483_v45 = vsub.f32 %v465_v35, %v481_v43  ;;  %v482_v46 = vmul.f32 0.03125, %v479_v44 }
 0x32d   : > { %v484_v47 = vsub.f32 %v468_v38, %v482_v46  ;;  %v485_v48 = vmul.f32 %v483_v45, %v483_v45 }
 0x32f   : > { %v487_v49 = vsel %vm473_vm2, %v485_v48, 0.0  ;;  %v486_v50 = vmul.f32 %v484_v47, %v484_v47 }
 0x330   : > { %488 = vadd.xlane.f32.xlu0 %v487_v49 }
 0x331   : > { %v490_v51 = vsel %vm473_vm2, %v486_v50, 0.0 }
 0x332   : > { %491 = vadd.xlane.f32.xlu1 %v490_v51 }
 0x3bd   : > { %v489_v52 = vpop.xlane.xlu0 %488 }
 0x3be   : > { %v493_v53 = vmul.f32 0.03125, %v489_v52 }
 0x3bf   : > { %v492_v54 = vpop.xlane.xlu1 %491 }
 0x3c0   : > { %v495_v55 = vadd.f32 1e-05, %v493_v53  ;;  %v494_v56 = vmul.f32 0.03125, %v492_v54 }
 0x3c2   : > { %777 = vrsqrt.f32 %v495_v55  ;;  %v496_v57 = vadd.f32 1e-05, %v494_v56 }
 0x3c4   : > { %779 = vrsqrt.f32 %v496_v57 }
 0x3cc   : > { %v778_v58 = vpop.eup %777 }
 0x3cd   : > { %v499_v60 = vmul.f32 %v778_v58, %v483_v45 }
 0x3ce   : > { %v780_v61 = vpop.eup %779 }
 0x3cf   : > { %v507_v63 = vmul.f32 %v668_v59, %v499_v60  ;;  %v500_v0 = vmul.f32 %v780_v61, %v484_v47 }
 0x3d1   : > { %v515_v2 = vadd.f32 %v669_v62, %v507_v63  ;;  %v508_v3 = vmul.f32 %v668_v59, %v500_v0 }
 0x3d3   : > { %v519_v5 = vadd.f32 %v517_v1, %v515_v2  ;;  %v516_v6 = vadd.f32 %v669_v62, %v508_v3 }
 0x3d5   : > { %v678_v7 = vpack.c.bf16 %v519_v5, %v519_v5  ;;  %v520_v8 = vadd.f32 %v518_v4, %v516_v6 }
 0x3d7   : > { %v679_v9 = vpack.c.bf16 %v520_v8, %v520_v8  ;;  %530 = vst.msk [vmem:[%s361_s11] sm:$0xf] %vm529_vm3, %v678_v7 }
 0x3d9   : > { %531 = vst.msk [vmem:[%s361_s11 + $0x4] sm:$0xf] %vm529_vm3, %v679_v9 }
 0x3da   : > { %908 = shalt.err (!%p905_p13)
}
 0x3db   : > { %s909_s14 = scalar_lea.hbm %s1264_s23, 128  ;;  %s913_s11 = scalar_lea.hbm %s1318_s8, 256 }
 0x3dc   : > { %p910_p0 = scmp.ne.s32.totalorder %s1264_s23, %s909_s14  ;;  %p914_p11 = scmp.lt.u32.totalorder %s1264_s23, %s1318_s8 }
 0x3dd   : > { %p915_p12 = scmp.lt.u32.totalorder %s913_s11, %s909_s14  ;;  %p917_p1 = scmp.lt.u32.totalorder %s909_s14, %s1264_s23 }
 0x3de   : > { %p911_p5 = pnand %p910_p0, %p1171_p6 }
 0x3df   : > { %p916_p2 = por %p915_p12, %p914_p11 }
 0x3e0   : > { %p912_p9 = pneg %p911_p5 }
 0x3e1   : > { %p918_p4 = por %p917_p1, %p916_p2 }
 0x3e3   : > { %p919_p8 = pnand %p918_p4, %p912_p9 }
 0x3e5   : > { %922 = shalt.err (!%p919_p8)
}
 0x3e6   : > { %s980_s9 = smov 64   ;;  %s981_s15 = smov 4  }
 0x3e7   : > { %703 = dma.vmem_to_hbm [thread:$0]  (%p1171_p6), %s1266_s13, 128, %s1264_s23, %s533_s18, %s980_s9, %s980_s9, %s981_s15  }
 0x3e8 PF: > { %s561_s24 = sand.u32 1, %s957_s27   ;;  %p1336_p3 = scmp.ne.s32.totalorder %s1323_s12, 0 }
 0x3e9   : > { %p1337_p7 = scmp.ge.s32.totalorder %s969_s30, 2  ;;  %s562_s19 = scalar_lea.sflag [#allocation4], %s561_s24 }
 0x3eb   : > { %p720_p10 = pnand %p1337_p7, %p1336_p3 }
 0x3ed   : > { %952 = dma.done.wait (!%p720_p10), %s562_s19, 128  }
 0x3ee   : > { %954 = vsyncadd (!%p720_p10), %s562_s19, 4294967168  ;;  %p23_p13 = scmp.ge.s32.totalorder %s1157_s26, 4   ;;  %s1338_s27 = smov %s961_s28 }
 0x3ef   : > { %s1339_s28 = smov %s965_s29  ;;  %s1340_s29 = smov %s1167_s25 }
 0x3f0   : > { %s1341_s30 = smov %s1157_s26  ;;  %25 = sbr.rel (!%p23_p13) target bundleno = 7 (0x7), region = 109 }
 0x3f7   :  { %567 = vsyncpa [#allocation3], 1 }
 0x3f8   :  { %569 = vsyncpa [#allocation3 + $0x1], 1 }
 0x3f9   :  { %570 = vsyncpa [#allocation6], 1 }
 0x3fa   :  { %571 = vsyncpa [#allocation9], 1 }
 0x3fb   :  { %572 = vsyncpa [#allocation4], 1 }
 0x3fc   :  { %574 = vsyncpa [#allocation4 + $0x1], 1 }

</bundles_post_ra>
